<compile_context>
chip_gen: v6e
topology: v6e:2x2x1
jax: 0.10.0
libtpu: 0.0.40
codegen_flags: <defaults>
</compile_context>

<pallas_src>
import functools

import jax
import jax.numpy as jnp
from jax import lax
from jax.experimental import pallas as pl
from jax.experimental.pallas import tpu as pltpu


def _round_up(x, m):
    return ((x + m - 1) // m) * m


def _round_down(x, m):
    return (x // m) * m


def _vmem_capacity_bytes():
    try:
        return int(pltpu.get_tpu_info().vmem_capacity_bytes)
    except Exception:
        return 64 * 1024 * 1024  # conservative fallback (v7x per-TC VMEM)


def _ce_partial_kernel(x_ref, t_ref, o_ref, *, n_rows, tile_rows, targets_resident):
    """Writes the per-tile partial sum of per-example cross-entropy (lane-dense)."""
    i = pl.program_id(0)

    x = x_ref[...].astype(jnp.float32)          # (TB, C) native-dtype ingest, f32 in vregs
    TB, C = x.shape

    if targets_resident:
        start = pl.multiple_of(i * tile_rows, 8)
        t = t_ref[pl.ds(start, tile_rows), :]    # (TB, 1) int32, sliced from resident block
    else:
        t = t_ref[...]                           # (TB, 1) int32 per-tile block

    # Numerically stable log-sum-exp; keep per-row values (TB, 1).
    # `x - m` feeds only exp, so no second full-width f32 temp needs to live in VMEM.
    m = jnp.max(x, axis=-1, keepdims=True)                        # (TB, 1)
    sum_exp = jnp.sum(jnp.exp(x - m), axis=-1, keepdims=True)     # (TB, 1)

    # Gather the target logit directly from x.
    class_ids = lax.broadcasted_iota(jnp.int32, (TB, C), 1)
    x_t = jnp.sum(jnp.where(class_ids == t, x, 0.0),
                  axis=-1, keepdims=True)                         # (TB, 1)

    per_example = jnp.log(sum_exp) + m - x_t                      # (TB, 1) CE per row

    # Mask rows that are padding in the last tile.
    row = i * tile_rows + lax.broadcasted_iota(jnp.int32, (TB, 1), 0)
    per_example = jnp.where(row < n_rows, per_example, 0.0)

    partial = jnp.sum(per_example, axis=0, keepdims=True)         # (1, 1)
    o_ref[...] = jnp.broadcast_to(partial.reshape(1, 1, 1), o_ref.shape)


def focal_loss(inputs, targets, alpha=1.0, gamma=2.0, max_tile_rows=None):
    """inputs: (B, C) float logits (any float dtype), targets: (B,) int labels -> scalar f32."""
    B, C = inputs.shape
    x = jnp.asarray(inputs)                                # keep native dtype (e.g. bf16)
    t = jnp.asarray(targets, dtype=jnp.int32).reshape(B, 1)

    itemsize = jnp.dtype(x.dtype).itemsize
    bytes_per_row = max(C * itemsize, 1)

    # Generation-dependent budgets: v5e/v6e (128 MiB VMEM) take bigger tiles; on v7x
    # (64 MiB) keep the logits tile smaller to budget for the f32 temporaries.
    vmem_cap = _vmem_capacity_bytes()
    if vmem_cap >= 96 * 1024 * 1024:
        target_tile_bytes = 8 * 1024 * 1024
        vmem_limit = 80 * 1024 * 1024
    else:
        target_tile_bytes = 4 * 1024 * 1024
        vmem_limit = 48 * 1024 * 1024

    # Row tile sized by bytes (no hard row cap): biggest multiple of 8 rows that fits
    # the byte budget, clamped to the (padded) batch.
    tb = max(8, _round_down(target_tile_bytes // bytes_per_row, 8))
    tb = min(tb, _round_up(B, 8))
    if max_tile_rows is not None:
        tb = min(tb, max(8, _round_down(int(max_tile_rows), 8)))
    b_pad = _round_up(B, tb)
    n_tiles = b_pad // tb

    if b_pad != B:
        x = jnp.pad(x, ((0, b_pad - B), (0, 0)))
        t = jnp.pad(t, ((0, b_pad - B), (0, 0)))

    # Targets resident in VMEM (fetched once, constant block index) unless the padded
    # lane-width buffer (~b_pad*512 B) would be big, in which case tile them.
    targets_resident = (b_pad * 512) <= (1 * 1024 * 1024)
    if targets_resident:
        t_spec = pl.BlockSpec((b_pad, 1), lambda i: (0, 0))
    else:
        t_spec = pl.BlockSpec((tb, 1), lambda i: (i, 0))

    # Deeper pipelining when tiles are unavoidably tiny (short compute per DMA issue).
    x_index = lambda i: (i, 0)
    small_tile = (tb * bytes_per_row) < (256 * 1024) and n_tiles >= 3
    if small_tile:
        try:
            x_spec = pl.BlockSpec((tb, C), x_index, pipeline_mode=pl.Buffered(3))
        except TypeError:  # older BlockSpec without pipeline_mode
            x_spec = pl.BlockSpec((tb, C), x_index)
    else:
        x_spec = pl.BlockSpec((tb, C), x_index)

    kernel = functools.partial(
        _ce_partial_kernel,
        n_rows=B, tile_rows=tb, targets_resident=targets_resident,
    )

    # Each grid step writes its OWN lane-dense (1,1,128) partial -> safe to mark the
    # batch-tile axis "parallel" (v7x megacore) and no serial scalar accumulation.
    partials = pl.pallas_call(
        kernel,
        out_shape=jax.ShapeDtypeStruct((n_tiles, 1, 128), jnp.float32),
        grid_spec=pltpu.PrefetchScalarGridSpec(
            num_scalar_prefetch=0,
            grid=(n_tiles,),
            in_specs=[x_spec, t_spec],
            out_specs=pl.BlockSpec((1, 1, 128), lambda i: (i, 0, 0)),
        ),
        compiler_params=pltpu.CompilerParams(
            dimension_semantics=("parallel",),
            vmem_limit_bytes=vmem_limit,
        ),
    )(x, t)

    # Mean + focal transform on the tiny partials array in plain JAX.
    ce = jnp.sum(partials[:, 0, 0]) / jnp.float32(B)
    u = 1.0 - jnp.exp(-ce)
    g = float(gamma)
    w = u ** (int(g) if g.is_integer() else g)   # integer power for the common gamma=2
    return jnp.float32(alpha) * w * ce


def _reference_focal_loss(inputs, targets, alpha=1.0, gamma=2.0):
    # pure-JAX reference (matches torch F.cross_entropy mean reduction + focal scalar)
    logp = jax.nn.log_softmax(inputs.astype(jnp.float32), axis=-1)
    nll = -jnp.take_along_axis(logp, targets[:, None].astype(jnp.int32), axis=-1)[:, 0]
    ce = jnp.mean(nll)
    return alpha * (1.0 - jnp.exp(-ce)) ** gamma * ce


if __name__ == "__main__":
    key = jax.random.PRNGKey(0)
    k1, k2, k3, k4, k5, k6 = jax.random.split(key, 6)

    # Test 1: small f32 shapes matching the module's (batch, dim) signature.
    B, C = 8, 32
    inputs = jax.random.normal(k1, (B, C), dtype=jnp.float32)
    targets = jax.random.randint(k2, (B,), 0, C, dtype=jnp.int32)
    loss = jax.block_until_ready(focal_loss(inputs, targets, alpha=1.0, gamma=2.0))
    ref = _reference_focal_loss(inputs, targets, alpha=1.0, gamma=2.0)
    assert jnp.allclose(loss, ref, rtol=1e-5, atol=1e-5), (loss, ref)

    # Test 2: bf16 ingest + non-multiple-of-8 batch (exercises padding mask).
    B2, C2 = 20, 160
    inputs2 = jax.random.normal(k3, (B2, C2), dtype=jnp.bfloat16)
    targets2 = jax.random.randint(k4, (B2,), 0, C2, dtype=jnp.int32)
    loss2 = jax.block_until_ready(focal_loss(inputs2, targets2, alpha=0.5, gamma=2.0))
    ref2 = _reference_focal_loss(inputs2, targets2, alpha=0.5, gamma=2.0)
    assert jnp.allclose(loss2, ref2, rtol=1e-4, atol=1e-4), (loss2, ref2)

    # Test 3: multi-tile grid (parallel axis, resident-target slicing, per-tile partials).
    B3, C3 = 100, 64
    inputs3 = jax.random.normal(k5, (B3, C3), dtype=jnp.float32)
    targets3 = jax.random.randint(k6, (B3,), 0, C3, dtype=jnp.int32)
    loss3 = jax.block_until_ready(
        focal_loss(inputs3, targets3, alpha=1.0, gamma=2.0, max_tile_rows=16))
    ref3 = _reference_focal_loss(inputs3, targets3, alpha=1.0, gamma=2.0)
    assert jnp.allclose(loss3, ref3, rtol=1e-5, atol=1e-5), (loss3, ref3)

    print("KERNEL_OK")
</pallas_src>

<mosaic_0001>
module attributes {stable_mosaic.version = 11 : i64} {
  func.func @_ce_partial_kernel(%arg0: i32, %arg1: memref<8x32xf32, #tpu.memory_space<vmem>>, %arg2: memref<8x1xi32, #tpu.memory_space<vmem>>, %arg3: memref<1x1x128xf32, #tpu.memory_space<vmem>>) attributes {dimension_semantics = [#tpu.dimension_semantics<parallel>], iteration_bounds = array<i64: 1>, scalar_prefetch = 0 : i64, scratch_operands = 0 : i64, tpu.core_type = #tpu.core_type<tc>, window_params = [{transform_indices = @transform_0, window_bounds = array<i64: 8, 32>}, {pipeline_mode = #tpu.pipeline_mode<synchronous>, transform_indices = @transform_1, window_bounds = array<i64: 8, 1>}, {transform_indices = @transform_2, window_bounds = array<i64: 1, 1, 128>}]} {
    %c0 = arith.constant 0 : index
    %c0_0 = arith.constant 0 : index
    %0 = vector.load %arg1[%c0, %c0_0] : memref<8x32xf32, #tpu.memory_space<vmem>>, vector<8x32xf32>
    %c8_i32 = arith.constant 8 : i32
    %1 = arith.muli %arg0, %c8_i32 : i32
    %2 = tpu.assume_multiple %1, 8 : i32
    %3 = arith.index_cast %2 : i32 to index
    %c0_1 = arith.constant 0 : index
    %4 = vector.load %arg2[%3, %c0_1] : memref<8x1xi32, #tpu.memory_space<vmem>>, vector<8x1xi32>
    %cst = arith.constant dense<0xFF800000> : vector<8xf32>
    %5 = vector.multi_reduction <maximumf>, %0, %cst [1] : vector<8x32xf32> to vector<8xf32>
    %6 = vector.shape_cast %5 : vector<8xf32> to vector<8x1xf32>
    %7 = vector.broadcast %6 : vector<8x1xf32> to vector<8x32xf32>
    %8 = arith.subf %0, %7 : vector<8x32xf32>
    %9 = math.exp %8 : vector<8x32xf32>
    %cst_2 = arith.constant dense<0.000000e+00> : vector<8xf32>
    %10 = vector.multi_reduction <add>, %9, %cst_2 [1] : vector<8x32xf32> to vector<8xf32>
    %11 = vector.shape_cast %10 : vector<8xf32> to vector<8x1xf32>
    %12 = tpu.iota {dimensions = array<i32: 1>} : vector<8x32xi32>
    %13 = vector.broadcast %4 : vector<8x1xi32> to vector<8x32xi32>
    %14 = arith.cmpi eq, %12, %13 : vector<8x32xi32>
    %cst_3 = arith.constant 0.000000e+00 : f32
    %15 = vector.broadcast %cst_3 : f32 to vector<8x32xf32>
    %16 = arith.select %14, %0, %15 : vector<8x32xi1>, vector<8x32xf32>
    %cst_4 = arith.constant dense<0.000000e+00> : vector<8xf32>
    %17 = vector.multi_reduction <add>, %16, %cst_4 [1] : vector<8x32xf32> to vector<8xf32>
    %18 = vector.shape_cast %17 : vector<8xf32> to vector<8x1xf32>
    %19 = math.log %11 : vector<8x1xf32>
    %20 = arith.addf %19, %6 : vector<8x1xf32>
    %21 = arith.subf %20, %18 : vector<8x1xf32>
    %c8_i32_5 = arith.constant 8 : i32
    %22 = arith.muli %arg0, %c8_i32_5 : i32
    %23 = tpu.iota {dimensions = array<i32: 0>} : vector<8x1xi32>
    %24 = vector.broadcast %22 : i32 to vector<8x1xi32>
    %25 = arith.addi %24, %23 : vector<8x1xi32>
    %c8_i32_6 = arith.constant 8 : i32
    %26 = vector.broadcast %c8_i32_6 : i32 to vector<8x1xi32>
    %27 = arith.cmpi slt, %25, %26 : vector<8x1xi32>
    %cst_7 = arith.constant 0.000000e+00 : f32
    %28 = vector.broadcast %cst_7 : f32 to vector<8x1xf32>
    %29 = arith.select %27, %21, %28 : vector<8x1xi1>, vector<8x1xf32>
    %cst_8 = arith.constant dense<0.000000e+00> : vector<1xf32>
    %30 = vector.multi_reduction <add>, %29, %cst_8 [0] : vector<8x1xf32> to vector<1xf32>
    %31 = vector.shape_cast %30 : vector<1xf32> to vector<1x1xf32>
    %32 = vector.shape_cast %31 : vector<1x1xf32> to vector<1x1x1xf32>
    %33 = vector.shape_cast %32 : vector<1x1x1xf32> to vector<1x1x1xf32>
    %34 = vector.broadcast %33 : vector<1x1x1xf32> to vector<1x1x128xf32>
    %c0_9 = arith.constant 0 : index
    %c0_10 = arith.constant 0 : index
    %c0_11 = arith.constant 0 : index
    %35 = vector.load %arg3[%c0_9, %c0_10, %c0_11] : memref<1x1x128xf32, #tpu.memory_space<vmem>>, vector<1x1x128xf32>
    tpu.vector_store %arg3[%c0_9, %c0_10, %c0_11], %34 {strides = array<i32>} : memref<1x1x128xf32, #tpu.memory_space<vmem>>, vector<1x1x128xf32>,
    return
  }
  func.func @transform_0(%arg0: i32) -> (i32, i32) {
    %c0_i32 = arith.constant 0 : i32
    %c0_i32_0 = arith.constant 0 : i32
    return %arg0, %c0_i32 : i32, i32
  }
  func.func @transform_1(%arg0: i32) -> (i32, i32) {
    %c0_i32 = arith.constant 0 : i32
    %c0_i32_0 = arith.constant 0 : i32
    %c0_i32_1 = arith.constant 0 : i32
    return %c0_i32, %c0_i32_0 : i32, i32
  }
  func.func @transform_2(%arg0: i32) -> (i32, i32, i32) {
    %c0_i32 = arith.constant 0 : i32
    %c0_i32_0 = arith.constant 0 : i32
    %c0_i32_1 = arith.constant 0 : i32
    return %arg0, %c0_i32, %c0_i32_0 : i32, i32, i32
  }
}

</mosaic_0001>

<bundles_post_ra>
// kernel: tpu_custom_call.1
= control target key start
LH: loop header
LB: loop body
LE: loop exit
PB: predicated region body
PF: predicated region fallthrough
CT: control target
= control target key end

     0   :  { %vm16_vm0 = vcmask 261120   ;;  %s125_s0 = inlined_call_operand.vmem [shape: f32[8,32], index: 0, kind: input, shape index: {}]   ;;  %s126_s1 = inlined_call_operand.vmem [shape: s32[8,1], index: 1, kind: input, shape index: {}]   ;;  %s127_s2 = inlined_call_operand.hbm [shape: f32[1,1,128], index: 2, kind: output, shape index: {}]  }
   0x1   :  { %v12_v0 = vld [vmem:[%s125_s0] sm:$0xff] }
   0x2   :  { %7 = vsyncpa [#allocation3], 0  ;;  %v17_v1 = vsel %vm16_vm0, %v12_v0, -inf  ;;  %v96_v2 = vmov 0   ;;  %v15_v3 = vld [vmem:[%s126_s1] sm:$0xff]  ;;  %v26_v7 = vlaneseq  ;;  %s97_s0 = smov [#allocation2]  }
   0x3   :  { %69 = vset.pattern.permute.xlu0 %v96_v2  ;;  %s59_s1 = sshll.u32 %s97_s0, 4  ;;  %s60_s1 = int_to_ptr.vmem [resolvable:$true] %s59_s1 }
   0x4   :  { %18 = vmax.xlane.f32.xlu0 %v17_v1  ;;  %v27_v8 = vand.u32 127, %v26_v7  ;;  %s74_s13 = scalar_lea.vmem %s60_s1, 16  ;;  %s78_s14 = scalar_lea.vmem %s60_s1, 32 }
   0x5   :  { %p75_p0 = scmp.ne.s32.totalorder %s60_s1, %s74_s13  ;;  %p79_p1 = scmp.lt.s32.totalorder %s60_s1, %s60_s1 }
   0x6   :  { %p80_p2 = scmp.lt.s32.totalorder %s78_s14, %s74_s13 }
   0x8   :  { %p81_p3 = por %p80_p2, %p79_p1 }
   0xa   :  { %p82_p4 = pnand %p81_p3, %p75_p0 }
  0x1a   :  { %29 = vperm.xlu0 %69, %v15_v3  }
  0x8d   :  { %v19_v4 = vpop.xlane.xlu0 %18 }
  0x8e   :  { %v20_v5 = vsub.f32 %v12_v0, %v19_v4 }
  0x90   :  { %v21_v6 = vmul.f32 1.442695, %v20_v5 }
  0x92   :  { %70 = vpow2.f32 %v21_v6 }
  0x95   :  { %v30_v9 = vpop.permute.xlu0 %29 }
  0x96   :  { %vm31_vm1 = vcmp.eq.s32.totalorder %v27_v8, %v30_v9 }
  0x97   :  { %v32_v11 = vsel %vm31_vm1, %v12_v0, 0.0 }
  0x98   :  { %v33_v13 = vsel %vm16_vm0, %v32_v11, 0.0 }
  0x9f   :  { %v71_v10 = vpop.eup %70 }
  0xa0   :  { %v23_v12 = vsel %vm16_vm0, %v71_v10, 0.0 }
  0xa1   :  { %24 = vadd.xlane.f32.xlu1 %v23_v12 }
  0xa5   :  { %34 = vadd.xlane.f32.xlu1 %v33_v13 }
 0x12a   :  { %v25_v14 = vpop.xlane.xlu1 %24 }
 0x12b   :  { %72 = vlog2.f32 %v25_v14 }
 0x12e   :  { %v35_v17 = vpop.xlane.xlu1 %34 }
 0x138   :  { %v73_v15 = vpop.eup %72 }
 0x139   :  { %v37_v16 = vmul.f32 0.6931472, %v73_v15 }
 0x13b   :  { %v38_v18 = vadd.f32 %v37_v16, %v19_v4 }
 0x13d   :  { %v39_v19 = vsub.f32 %v38_v18, %v35_v17 }
 0x13f   :  { %v46_v20 = vrot.slane %v39_v19, 4 }
 0x141   :  { %v47_v21 = vadd.f32 %v46_v20, %v39_v19 }
 0x143   :  { %v48_v22 = vrot.slane %v47_v21, 2 }
 0x145   :  { %v49_v23 = vadd.f32 %v48_v22, %v47_v21 }
 0x147   :  { %v50_v24 = vrot.slane %v49_v23, 1 }
 0x149   :  { %v51_v25 = vadd.f32 %v50_v24, %v49_v23 }
 0x14b   :  { %52 = vst [vmem:[#allocation2] sm:$0x1] %v51_v25 }
 0x14c   :  { %85 = shalt.err (!%p82_p4)
}
 0x14d   :  { %62 = dma.vmem_to_hbm [thread:$0]  %s60_s1, 16, %s127_s2, [#allocation3]  }
 0x14e   :  { %94 = dma.done.wait [#allocation3], 16  }
 0x14f   :  { %95 = vsyncadd [#allocation3], 4294967280 }
 0x150   :  { %66 = vsyncpa [#allocation3], 1 }

</bundles_post_ra>
